<compile_context>
chip_gen: v5e
topology: v5e:2x2
jax: 0.10.0
libtpu: 0.0.40
codegen_flags: <defaults>
</compile_context>

<pallas_src>
import jax
import jax.numpy as jnp
from jax.experimental import pallas as pl
from jax.experimental.pallas import tpu as pltpu

# --- module hyperparameters (from the PyTorch source) ---
BLOCK_SIZE = 120
DENSE_LAYER = 64
EMBEDDINGS = 8
N_HEAD = 2
HEAD_SIZE = EMBEDDINGS // N_HEAD          # 4
HEAD_PAD = 128                            # per-head q/k/v padded 64 -> 128 lanes
QKV_WIDTH = 3 * N_HEAD * HEAD_PAD         # 768 (lane-tile aligned per head)


def mha_kernel(x_ref, wqkv_ref, wout_ref, bout_ref, out_ref):
    """One grid step processes a block of batch elements.

    x_ref    : (Bb, T, C)   float32
    wqkv_ref : (C, 768)     bf16, [Q_h0|Q_h1|K_h0|K_h1|V_h0|V_h1], each head
                            padded to 128 lanes; softmax scale folded into Q.
    wout_ref : (NH, 128, C) bf16, per-head output projection (rows 64..127 zero)
    bout_ref : (1, C)       f32, output projection bias
    out_ref  : (Bb, T, C)   float32 final module output
    """
    Bb, T, C = x_ref.shape

    # Flattened, lane-dense projection: (Bb*T, C) @ (C, 768), bf16 in / f32 acc.
    x2 = x_ref[...].astype(jnp.bfloat16).reshape(Bb * T, C)
    qkv = jnp.dot(x2, wqkv_ref[...], preferred_element_type=jnp.float32)
    qkv = qkv.reshape(Bb, T, QKV_WIDTH)

    # causal mask (hoisted out of the head loop): row >= col  (tril == 1)
    row = jax.lax.broadcasted_iota(jnp.int32, (T, T), 0)
    col = jax.lax.broadcasted_iota(jnp.int32, (T, T), 1)
    causal = row >= col

    acc = jnp.zeros((Bb * T, C), jnp.float32)
    for h in range(N_HEAD):                          # static 2-iteration loop
        # 128-lane-aligned slices (padding lanes are exactly zero).
        q = qkv[:, :, h * HEAD_PAD:(h + 1) * HEAD_PAD]
        k = qkv[:, :, (N_HEAD + h) * HEAD_PAD:(N_HEAD + h + 1) * HEAD_PAD]
        v = qkv[:, :, (2 * N_HEAD + h) * HEAD_PAD:(2 * N_HEAD + h + 1) * HEAD_PAD]

        # scores; scale C**-0.5 already folded into fused Q weights.
        wei = jnp.einsum('bqd,bkd->bqk',
                         q.astype(jnp.bfloat16), k.astype(jnp.bfloat16),
                         preferred_element_type=jnp.float32)       # (Bb, T, T)
        wei = jnp.where(causal, wei, jnp.float32(-1e30))

        # numerically-stable softmax, f32 chain (v5e-safe), EUP reciprocal.
        m = jnp.max(wei, axis=-1, keepdims=True)
        e = jnp.exp(wei - m)
        p = e * pl.reciprocal(jnp.sum(e, axis=-1, keepdims=True), approx=True)
        # TODO(synk): attention-dropout omitted (inference / eval mode).

        ho = jnp.einsum('bqk,bkd->bqd',
                        p.astype(jnp.bfloat16), v.astype(jnp.bfloat16),
                        preferred_element_type=jnp.float32)        # (Bb, T, 128)

        # Fused per-head output projection: (Bb*T, 128) @ (128, C), accumulate.
        acc = acc + jnp.dot(ho.reshape(Bb * T, HEAD_PAD).astype(jnp.bfloat16),
                            wout_ref[h], preferred_element_type=jnp.float32)

    # TODO(synk): output dropout omitted (inference / eval mode).
    out_ref[...] = (acc + bout_ref[...]).reshape(Bb, T, C)


def fuse_params(p):
    """Fold two-stage projections + softmax scale offline; pad heads to 128 lanes."""
    C, D = EMBEDDINGS, DENSE_LAYER
    scale = jnp.float32(C) ** jnp.float32(-0.5)

    wq_eff = jnp.einsum('hcs,hsd->hcd', p["wq"], p["wdq"]) * scale   # (NH, C, D)
    wk_eff = jnp.einsum('hcs,hsd->hcd', p["wk"], p["wdk"])
    wv_eff = jnp.einsum('hcs,hsd->hcd', p["wv"], p["wdv"])

    def pad_blk(w):   # (NH, C, D) -> (C, NH*128), zero-padded, head-major, tile-aligned
        wpad = jnp.pad(w, ((0, 0), (0, 0), (0, HEAD_PAD - D)))       # (NH, C, 128)
        return jnp.transpose(wpad, (1, 0, 2)).reshape(C, N_HEAD * HEAD_PAD)

    w_qkv = jnp.concatenate([pad_blk(wq_eff), pad_blk(wk_eff), pad_blk(wv_eff)],
                            axis=1).astype(jnp.bfloat16)             # (C, 768)

    # Per-head output projection, rows padded 64 -> 128 (padding rows zero).
    wp = p["wp"].reshape(N_HEAD, D, C)                               # (NH, 64, C)
    w_out = jnp.pad(wp, ((0, 0), (0, HEAD_PAD - D), (0, 0))).astype(jnp.bfloat16)

    return {"w_qkv": w_qkv, "w_out": w_out, "b_out": p["bp"].astype(jnp.float32)}


def _choose_batch_block(B, T, *, vmem_budget_bytes=8 << 20, min_blocks=2):
    """Largest batch_block that (a) keeps >= min_blocks grid steps so the
    BlockSpec pipeline and v7x's two TensorCores have work, and (b) keeps the
    per-block live set under a conservative VMEM budget (v5e 16 MiB scoped
    default). Re-derive / pass explicitly for other generations (v7x: 64 MiB
    physical per TC)."""
    bytes_per_row = (
        2 * T * EMBEDDINGS * 4          # x block, double-buffered, f32
        + T * QKV_WIDTH * 6             # qkv f32 intermediate + bf16 casts
        + 3 * T * T * 4                 # scores / exp / probs, f32
        + T * HEAD_PAD * 6              # per-head PV result f32 + bf16 cast
        + 2 * T * EMBEDDINGS * 4        # out block, double-buffered, f32
    )
    fitting = [bb for bb in range(1, B + 1)
               if B % bb == 0 and bb * bytes_per_row <= vmem_budget_bytes]
    if not fitting:
        return 1
    pipelined = [bb for bb in fitting if B // bb >= min_blocks]
    return max(pipelined) if pipelined else max(fitting)


def multi_head_attention(x, fused, *, batch_block=None, vmem_limit_bytes=None):
    """x: (B, T, C) float32.  Returns (B, T, C) float32."""
    B, T, C = x.shape
    assert C == EMBEDDINGS

    if batch_block is None:
        batch_block = _choose_batch_block(B, T)
    assert B % batch_block == 0
    num_blocks = B // batch_block

    return pl.pallas_call(
        mha_kernel,
        out_shape=jax.ShapeDtypeStruct((B, T, C), jnp.float32),
        grid_spec=pltpu.PrefetchScalarGridSpec(
            num_scalar_prefetch=0,
            grid=(num_blocks,),
            in_specs=[
                pl.BlockSpec((batch_block, T, C), lambda b: (b, 0, 0)),           # x
                pl.BlockSpec((EMBEDDINGS, QKV_WIDTH), lambda b: (0, 0)),          # w_qkv
                pl.BlockSpec((N_HEAD, HEAD_PAD, EMBEDDINGS), lambda b: (0, 0, 0)),# w_out
                pl.BlockSpec((1, EMBEDDINGS), lambda b: (0, 0)),                  # b_out
            ],
            out_specs=pl.BlockSpec((batch_block, T, C), lambda b: (b, 0, 0)),
        ),
        compiler_params=pltpu.CompilerParams(
            dimension_semantics=("parallel",),
            vmem_limit_bytes=vmem_limit_bytes),
    )(x, fused["w_qkv"], fused["w_out"], fused["b_out"])


def make_params(key):
    """Deterministic parameter init; weights stored as (in, out)."""
    keys = jax.random.split(key, 9)
    scale = 0.1
    C, H, D = EMBEDDINGS, HEAD_SIZE, DENSE_LAYER
    return {
        "wk":  jax.random.normal(keys[0], (N_HEAD, C, H), jnp.float32) * scale,
        "wdk": jax.random.normal(keys[1], (N_HEAD, H, D), jnp.float32) * scale,
        "wq":  jax.random.normal(keys[2], (N_HEAD, C, H), jnp.float32) * scale,
        "wdq": jax.random.normal(keys[3], (N_HEAD, H, D), jnp.float32) * scale,
        "wv":  jax.random.normal(keys[4], (N_HEAD, C, H), jnp.float32) * scale,
        "wdv": jax.random.normal(keys[5], (N_HEAD, H, D), jnp.float32) * scale,
        "wp":  jax.random.normal(keys[6], (N_HEAD * D, C), jnp.float32) * scale,
        "bp":  jax.random.normal(keys[7], (1, C), jnp.float32) * scale,
    }


def reference(x, p):
    """Pure-JAX f32 reference mirroring the PyTorch forward (eval mode)."""
    B, T, C = x.shape
    outs = []
    for h in range(N_HEAD):
        k = x @ p["wk"][h] @ p["wdk"][h]
        q = x @ p["wq"][h] @ p["wdq"][h]
        wei = (q @ jnp.swapaxes(k, -2, -1)) * (C ** -0.5)
        mask = jnp.tril(jnp.ones((T, T), bool))
        wei = jnp.where(mask, wei, -jnp.inf)
        wei = jax.nn.softmax(wei, axis=-1)
        v = x @ p["wv"][h] @ p["wdv"][h]
        outs.append(wei @ v)
    cat = jnp.concatenate(outs, axis=-1)
    return cat @ p["wp"] + p["bp"][0]


if __name__ == "__main__":
    key = jax.random.PRNGKey(0)
    kx, kp = jax.random.split(key)

    # Small deterministic test shapes (T <= block_size=120, C = embeddings=8).
    # B=4 -> batch_block=2 -> 2 pipelined/parallel grid steps.
    B, T, C = 4, 8, EMBEDDINGS
    x = jax.random.normal(kx, (B, T, C), jnp.float32)
    params = make_params(kp)
    fused = fuse_params(params)

    out = multi_head_attention(x, fused)
    out = jax.block_until_ready(out)

    ref = reference(x, params)
    assert out.shape == (B, T, C)
    # Tolerance accounts for bf16 MXU inputs, approx EUP reciprocal and the
    # offline f32 weight-fusion reassociation vs the two-stage f32 reference.
    assert jnp.allclose(out, ref, atol=1e-2, rtol=1e-2), "mismatch vs reference"

    print("KERNEL_OK")
</pallas_src>

<mosaic_0001>
module attributes {stable_mosaic.version = 11 : i64} {
  func.func @mha_kernel(%arg0: i32, %arg1: memref<2x8x8xf32, #tpu.memory_space<vmem>>, %arg2: memref<8x768xbf16, #tpu.memory_space<vmem>>, %arg3: memref<2x128x8xbf16, #tpu.memory_space<vmem>>, %arg4: memref<1x8xf32, #tpu.memory_space<vmem>>, %arg5: memref<2x8x8xf32, #tpu.memory_space<vmem>>) attributes {dimension_semantics = [#tpu.dimension_semantics<parallel>], iteration_bounds = array<i64: 2>, scalar_prefetch = 0 : i64, scratch_operands = 0 : i64, tpu.core_type = #tpu.core_type<tc>, window_params = [{transform_indices = @transform_0, window_bounds = array<i64: 2, 8, 8>}, {pipeline_mode = #tpu.pipeline_mode<synchronous>, transform_indices = @transform_1, window_bounds = array<i64: 8, 768>}, {pipeline_mode = #tpu.pipeline_mode<synchronous>, transform_indices = @transform_2, window_bounds = array<i64: 2, 128, 8>}, {pipeline_mode = #tpu.pipeline_mode<synchronous>, transform_indices = @transform_3, window_bounds = array<i64: 1, 8>}, {transform_indices = @transform_4, window_bounds = array<i64: 2, 8, 8>}]} {
    %c0 = arith.constant 0 : index
    %c0_0 = arith.constant 0 : index
    %c0_1 = arith.constant 0 : index
    %0 = vector.load %arg1[%c0, %c0_0, %c0_1] : memref<2x8x8xf32, #tpu.memory_space<vmem>>, vector<2x8x8xf32>
    %1 = arith.truncf %0 : vector<2x8x8xf32> to vector<2x8x8xbf16>
    %2 = vector.shape_cast %1 : vector<2x8x8xbf16> to vector<16x8xbf16>
    %c0_2 = arith.constant 0 : index
    %c0_3 = arith.constant 0 : index
    %3 = vector.load %arg2[%c0_2, %c0_3] : memref<8x768xbf16, #tpu.memory_space<vmem>>, vector<8x768xbf16>
    %cst = arith.constant dense<0.000000e+00> : vector<16x768xf32>
    %4 = tpu.matmul %2, %3, %cst {dimension_numbers = #tpu.dot_dimension_numbers<[1], [0], [0], [1], [0, 0, 1, 1], [], []>} : vector<16x8xbf16>, vector<8x768xbf16>, vector<16x768xf32> -> vector<16x768xf32>
    %5 = vector.shape_cast %4 : vector<16x768xf32> to vector<2x8x768xf32>
    %6 = tpu.iota {dimensions = array<i32: 0>} : vector<8x8xi32>
    %7 = tpu.iota {dimensions = array<i32: 1>} : vector<8x8xi32>
    %8 = arith.cmpi sge, %6, %7 : vector<8x8xi32>
    %cst_4 = arith.constant 0.000000e+00 : f32
    %9 = vector.broadcast %cst_4 : f32 to vector<16x8xf32>
    %10 = vector.extract_strided_slice %5 {offsets = [0, 0, 0], sizes = [2, 8, 128], strides = [1, 1, 1]} : vector<2x8x768xf32> to vector<2x8x128xf32>
    %11 = vector.extract_strided_slice %5 {offsets = [0, 0, 256], sizes = [2, 8, 128], strides = [1, 1, 1]} : vector<2x8x768xf32> to vector<2x8x128xf32>
    %12 = vector.extract_strided_slice %5 {offsets = [0, 0, 512], sizes = [2, 8, 128], strides = [1, 1, 1]} : vector<2x8x768xf32> to vector<2x8x128xf32>
    %13 = arith.truncf %10 : vector<2x8x128xf32> to vector<2x8x128xbf16>
    %14 = arith.truncf %11 : vector<2x8x128xf32> to vector<2x8x128xbf16>
    "tpu.trace_start"() <{level = 10 : i32, message = "bqd,bkd->bqk"}> : () -> ()
    %cst_5 = arith.constant dense<0.000000e+00> : vector<2x8x8xf32>
    %15 = tpu.matmul %13, %14, %cst_5 {dimension_numbers = #tpu.dot_dimension_numbers<[2], [2], [1], [1], [0, 0, 0, 1, 1, 1], [0], [0]>} : vector<2x8x128xbf16>, vector<2x8x128xbf16>, vector<2x8x8xf32> -> vector<2x8x8xf32>
    %cst_6 = arith.constant -1.000000e+30 : f32
    "tpu.trace_stop"() : () -> ()
    %16 = vector.shape_cast %8 : vector<8x8xi1> to vector<1x8x8xi1>
    %17 = vector.broadcast %16 : vector<1x8x8xi1> to vector<2x8x8xi1>
    %18 = vector.broadcast %cst_6 : f32 to vector<2x8x8xf32>
    %19 = arith.select %17, %15, %18 : vector<2x8x8xi1>, vector<2x8x8xf32>
    %cst_7 = arith.constant dense<0xFF800000> : vector<2x8xf32>
    %20 = vector.multi_reduction <maximumf>, %19, %cst_7 [2] : vector<2x8x8xf32> to vector<2x8xf32>
    %21 = vector.shape_cast %20 : vector<2x8xf32> to vector<2x8x1xf32>
    %22 = vector.broadcast %21 : vector<2x8x1xf32> to vector<2x8x8xf32>
    %23 = arith.subf %19, %22 : vector<2x8x8xf32>
    %24 = math.exp %23 : vector<2x8x8xf32>
    %cst_8 = arith.constant dense<0.000000e+00> : vector<2x8xf32>
    %25 = vector.multi_reduction <add>, %24, %cst_8 [2] : vector<2x8x8xf32> to vector<2x8xf32>
    %26 = vector.shape_cast %25 : vector<2x8xf32> to vector<2x8x1xf32>
    %27 = tpu.reciprocal %26 {approx = true} : vector<2x8x1xf32> -> vector<2x8x1xf32>
    %28 = vector.broadcast %27 : vector<2x8x1xf32> to vector<2x8x8xf32>
    %29 = arith.mulf %24, %28 : vector<2x8x8xf32>
    %30 = arith.truncf %29 : vector<2x8x8xf32> to vector<2x8x8xbf16>
    %31 = arith.truncf %12 : vector<2x8x128xf32> to vector<2x8x128xbf16>
    "tpu.trace_start"() <{level = 10 : i32, message = "bqk,bkd->bqd"}> : () -> ()
    %cst_9 = arith.constant dense<0.000000e+00> : vector<2x8x128xf32>
    %32 = tpu.matmul %30, %31, %cst_9 {dimension_numbers = #tpu.dot_dimension_numbers<[2], [1], [1], [2], [0, 0, 0, 1, 1, 2], [0], [0]>} : vector<2x8x8xbf16>, vector<2x8x128xbf16>, vector<2x8x128xf32> -> vector<2x8x128xf32>
    "tpu.trace_stop"() : () -> ()
    %33 = vector.shape_cast %32 : vector<2x8x128xf32> to vector<16x128xf32>
    %34 = arith.truncf %33 : vector<16x128xf32> to vector<16x128xbf16>
    %c0_10 = arith.constant 0 : index
    %c0_11 = arith.constant 0 : index
    %c0_12 = arith.constant 0 : index
    %35 = vector.load %arg3[%c0_10, %c0_11, %c0_12] : memref<2x128x8xbf16, #tpu.memory_space<vmem>>, vector<1x128x8xbf16>
    %36 = vector.shape_cast %35 : vector<1x128x8xbf16> to vector<128x8xbf16>
    %cst_13 = arith.constant dense<0.000000e+00> : vector<16x8xf32>
    %37 = tpu.matmul %34, %36, %cst_13 {dimension_numbers = #tpu.dot_dimension_numbers<[1], [0], [0], [1], [0, 0, 1, 1], [], []>} : vector<16x128xbf16>, vector<128x8xbf16>, vector<16x8xf32> -> vector<16x8xf32>
    %38 = arith.addf %9, %37 : vector<16x8xf32>
    %39 = vector.extract_strided_slice %5 {offsets = [0, 0, 128], sizes = [2, 8, 128], strides = [1, 1, 1]} : vector<2x8x768xf32> to vector<2x8x128xf32>
    %40 = vector.extract_strided_slice %5 {offsets = [0, 0, 384], sizes = [2, 8, 128], strides = [1, 1, 1]} : vector<2x8x768xf32> to vector<2x8x128xf32>
    %41 = vector.extract_strided_slice %5 {offsets = [0, 0, 640], sizes = [2, 8, 128], strides = [1, 1, 1]} : vector<2x8x768xf32> to vector<2x8x128xf32>
    %42 = arith.truncf %39 : vector<2x8x128xf32> to vector<2x8x128xbf16>
    %43 = arith.truncf %40 : vector<2x8x128xf32> to vector<2x8x128xbf16>
    "tpu.trace_start"() <{level = 10 : i32, message = "bqd,bkd->bqk"}> : () -> ()
    %cst_14 = arith.constant dense<0.000000e+00> : vector<2x8x8xf32>
    %44 = tpu.matmul %42, %43, %cst_14 {dimension_numbers = #tpu.dot_dimension_numbers<[2], [2], [1], [1], [0, 0, 0, 1, 1, 1], [0], [0]>} : vector<2x8x128xbf16>, vector<2x8x128xbf16>, vector<2x8x8xf32> -> vector<2x8x8xf32>
    %cst_15 = arith.constant -1.000000e+30 : f32
    "tpu.trace_stop"() : () -> ()
    %45 = vector.shape_cast %8 : vector<8x8xi1> to vector<1x8x8xi1>
    %46 = vector.broadcast %45 : vector<1x8x8xi1> to vector<2x8x8xi1>
    %47 = vector.broadcast %cst_15 : f32 to vector<2x8x8xf32>
    %48 = arith.select %46, %44, %47 : vector<2x8x8xi1>, vector<2x8x8xf32>
    %cst_16 = arith.constant dense<0xFF800000> : vector<2x8xf32>
    %49 = vector.multi_reduction <maximumf>, %48, %cst_16 [2] : vector<2x8x8xf32> to vector<2x8xf32>
    %50 = vector.shape_cast %49 : vector<2x8xf32> to vector<2x8x1xf32>
    %51 = vector.broadcast %50 : vector<2x8x1xf32> to vector<2x8x8xf32>
    %52 = arith.subf %48, %51 : vector<2x8x8xf32>
    %53 = math.exp %52 : vector<2x8x8xf32>
    %cst_17 = arith.constant dense<0.000000e+00> : vector<2x8xf32>
    %54 = vector.multi_reduction <add>, %53, %cst_17 [2] : vector<2x8x8xf32> to vector<2x8xf32>
    %55 = vector.shape_cast %54 : vector<2x8xf32> to vector<2x8x1xf32>
    %56 = tpu.reciprocal %55 {approx = true} : vector<2x8x1xf32> -> vector<2x8x1xf32>
    %57 = vector.broadcast %56 : vector<2x8x1xf32> to vector<2x8x8xf32>
    %58 = arith.mulf %53, %57 : vector<2x8x8xf32>
    %59 = arith.truncf %58 : vector<2x8x8xf32> to vector<2x8x8xbf16>
    %60 = arith.truncf %41 : vector<2x8x128xf32> to vector<2x8x128xbf16>
    "tpu.trace_start"() <{level = 10 : i32, message = "bqk,bkd->bqd"}> : () -> ()
    %cst_18 = arith.constant dense<0.000000e+00> : vector<2x8x128xf32>
    %61 = tpu.matmul %59, %60, %cst_18 {dimension_numbers = #tpu.dot_dimension_numbers<[2], [1], [1], [2], [0, 0, 0, 1, 1, 2], [0], [0]>} : vector<2x8x8xbf16>, vector<2x8x128xbf16>, vector<2x8x128xf32> -> vector<2x8x128xf32>
    "tpu.trace_stop"() : () -> ()
    %62 = vector.shape_cast %61 : vector<2x8x128xf32> to vector<16x128xf32>
    %63 = arith.truncf %62 : vector<16x128xf32> to vector<16x128xbf16>
    %c1 = arith.constant 1 : index
    %c0_19 = arith.constant 0 : index
    %c0_20 = arith.constant 0 : index
    %64 = vector.load %arg3[%c1, %c0_19, %c0_20] : memref<2x128x8xbf16, #tpu.memory_space<vmem>>, vector<1x128x8xbf16>
    %65 = vector.shape_cast %64 : vector<1x128x8xbf16> to vector<128x8xbf16>
    %cst_21 = arith.constant dense<0.000000e+00> : vector<16x8xf32>
    %66 = tpu.matmul %63, %65, %cst_21 {dimension_numbers = #tpu.dot_dimension_numbers<[1], [0], [0], [1], [0, 0, 1, 1], [], []>} : vector<16x128xbf16>, vector<128x8xbf16>, vector<16x8xf32> -> vector<16x8xf32>
    %67 = arith.addf %38, %66 : vector<16x8xf32>
    %c0_22 = arith.constant 0 : index
    %c0_23 = arith.constant 0 : index
    %68 = vector.load %arg4[%c0_22, %c0_23] : memref<1x8xf32, #tpu.memory_space<vmem>>, vector<1x8xf32>
    %69 = vector.broadcast %68 : vector<1x8xf32> to vector<16x8xf32>
    %70 = arith.addf %67, %69 : vector<16x8xf32>
    %71 = vector.shape_cast %70 : vector<16x8xf32> to vector<2x8x8xf32>
    %c0_24 = arith.constant 0 : index
    %c0_25 = arith.constant 0 : index
    %c0_26 = arith.constant 0 : index
    %72 = vector.load %arg5[%c0_24, %c0_25, %c0_26] : memref<2x8x8xf32, #tpu.memory_space<vmem>>, vector<2x8x8xf32>
    tpu.vector_store %arg5[%c0_24, %c0_25, %c0_26], %71 {strides = array<i32>} : memref<2x8x8xf32, #tpu.memory_space<vmem>>, vector<2x8x8xf32>,
    return
  }
  func.func @transform_0(%arg0: i32) -> (i32, i32, i32) {
    %c0_i32 = arith.constant 0 : i32
    %c0_i32_0 = arith.constant 0 : i32
    %c0_i32_1 = arith.constant 0 : i32
    return %arg0, %c0_i32, %c0_i32_0 : i32, i32, i32
  }
  func.func @transform_1(%arg0: i32) -> (i32, i32) {
    %c0_i32 = arith.constant 0 : i32
    %c0_i32_0 = arith.constant 0 : i32
    %c0_i32_1 = arith.constant 0 : i32
    return %c0_i32, %c0_i32_0 : i32, i32
  }
  func.func @transform_2(%arg0: i32) -> (i32, i32, i32) {
    %c0_i32 = arith.constant 0 : i32
    %c0_i32_0 = arith.constant 0 : i32
    %c0_i32_1 = arith.constant 0 : i32
    %c0_i32_2 = arith.constant 0 : i32
    return %c0_i32, %c0_i32_0, %c0_i32_1 : i32, i32, i32
  }
  func.func @transform_3(%arg0: i32) -> (i32, i32) {
    %c0_i32 = arith.constant 0 : i32
    %c0_i32_0 = arith.constant 0 : i32
    %c0_i32_1 = arith.constant 0 : i32
    return %c0_i32, %c0_i32_0 : i32, i32
  }
  func.func @transform_4(%arg0: i32) -> (i32, i32, i32) {
    %c0_i32 = arith.constant 0 : i32
    %c0_i32_0 = arith.constant 0 : i32
    %c0_i32_1 = arith.constant 0 : i32
    return %arg0, %c0_i32, %c0_i32_0 : i32, i32, i32
  }
}

</mosaic_0001>

<bundles_post_ra>
// kernel: tpu_custom_call.1
= control target key start
LH: loop header
LB: loop body
LE: loop exit
PB: predicated region body
PF: predicated region fallthrough
CT: control target
= control target key end

     0   :  { %9 = vsyncpa [#allocation3], 0  ;;  %s1232_s0 = inlined_call_operand.vmem [shape: f32[4,8,8], index: 0, kind: input, shape index: {}]   ;;  %s1233_s1 = inlined_call_operand.vmem [shape: bf16[8,768], index: 1, kind: input, shape index: {}]   ;;  %s1234_s2 = inlined_call_operand.vmem [shape: bf16[2,128,8], index: 2, kind: input, shape index: {}]   ;;  %s1235_s3 = inlined_call_operand.vmem [shape: f32[1,8], index: 3, kind: input, shape index: {}]   ;;  %s1236_s4 = inlined_call_operand.hbm [shape: f32[4,8,8], index: 4, kind: output, shape index: {}]  }
   0x1   :  { %11 = vsyncpa [#allocation3 + $0x1], 0  ;;  %s1046_s15 = smov 0   ;;  %s1048_s16 = smov 0  }
   0x2   :  { %s1050_s17 = smov 0   ;;  %s1052_s18 = smov 0  }
   0x3 LB: > { %s1067_s19 = sadd.s32 4294967295, %s1017_s18   ;;  %s778_s20 = sadd.s32 4294967294, %s1017_s18   ;;  %s1017_s18 = sphi %s1052_s18, %s1242_s18   ;;  %s1013_s17 = sphi %s1050_s17, %s1241_s17   ;;  %s1009_s16 = sphi %s1048_s16, %s1240_s16   ;;  %s1005_s15 = sphi %s1046_s15, %s1239_s15  }
   0x4   : > { %s1071_s21 = sadd.s32 1, %s1017_s18   ;;  %s113_s22 = sadd.s32 1, %s1013_s17 }
   0x5   : > { %s110_s23 = ssub.s32 %s1017_s18, %s1071_s21  ;;  %p123_p0 = scmp.ne.s32.totalorder %s1013_s17, %s1009_s16 }
   0x6   : > { %p111_p1 = scmp.eq.s32.totalorder %s110_s23, 0  ;;  %p124_p2 = scmp.eq.s32.totalorder %s1067_s19, 1 }
   0x7   : > { %p129_p3 = scmp.ne.s32.totalorder %s1009_s16, %s1005_s15  ;;  %p130_p4 = scmp.eq.s32.totalorder %s778_s20, 1 }
   0x8   : > { %s1082_s24 = scalar_select %p111_p1, %s1013_s17, %s113_s22  }
   0x9   : > { %p1084_p5 = por %p124_p2, %p123_p0  ;;  %p1088_p6 = por %p130_p4, %p129_p3 }
   0xa   : > { %p781_p7 = scmp.ge.s32.totalorder %s1017_s18, 1  ;;  %p166_p8 = scmp.lt.s32.totalorder %s1017_s18, 3 }
   0xc   : > { %p167_p9 = pnand %p781_p7, %p166_p8 }
   0xd   : > { %s783_s29 = sshll.u32 (!%p167_p9), %s1067_s19, 1  ;;  %s189_s10 = sand.u32 (!%p167_p9), 1, %s1009_s16  }
   0xe   : > { %170 = sbr.rel (%p167_p9) target bundleno = 859 (0x35b), region = 36  ;;  %p193_p10 = scmp.lt.s32.totalorder (!%p167_p9), %s783_s29, 3 }
   0xf   : > { %s782_s11 = sshll.u32 (!%p167_p9), %s189_s10, 4  ;;  %s896_s14 = sshll.u32 (!%p167_p9), %s1067_s19, 4 }
  0x10   : > { %s712_s23 = scalar_lea.hbm (!%p167_p9), %s1236_s4, %s896_s14  ;;  %s191_s27 = scalar_lea.vmem (!%p167_p9), [#allocation2], %s782_s11 }
  0x11   : > { %s713_s28 = sshll.u32 (!%p167_p9), %s191_s27, 4  ;;  %s701_s19 = scalar_lea.sflag (!%p167_p9), [#allocation3], %s189_s10  ;;  %s714_s28 = int_to_ptr.vmem [resolvable:$true] %s713_s28 }
  0x12   : > { %s975_s8 = scalar_lea.hbm (!%p167_p9), %s1236_s4, 32 }
  0x13   : > { %v205_v0 = vld [vmem:[%s1233_s1 + $0x8] sm:$0xff]  ;;  %v204_v1 = vld [vmem:[%s1233_s1] sm:$0xff]  ;;  %vm231_vm0 = vcmask 1043456   ;;  %s1244_s29 = smov (!%p193_p10, %s783_s29), 3  ;;  %vm227_vm1 = vcmask 64512   ;;  %v334_v37 = vlaneseq  ;;  %v206_v41 = vld [vmem:[%s1233_s1 + $0x10] sm:$0xff] }
  0x14   : > { %v217_v2 = vunpack.c.l.b16 %v205_v0  ;;  %v218_v3 = vunpack.c.h.b16 %v205_v0  ;;  %v215_v4 = vunpack.c.l.b16 %v204_v1  ;;  %v216_v5 = vunpack.c.h.b16 %v204_v1  ;;  %s784_s6 = sshll.u32 %s1244_s29, 3  ;;  %s715_s29 = sshll.u32 %s712_s23, 4  ;;  %s716_s29 = int_to_ptr.hbm [resolvable:$true] %s715_s29 }
  0x15   : > { %s196_s9 = scalar_lea.vmem %s1232_s0, %s784_s6  ;;  %v335_v38 = vshrl.u32 %v334_v37, 7  ;;  %v337_v39 = vand.u32 127, %v334_v37  ;;  %v219_v43 = vunpack.c.l.b16 %v206_v41  ;;  %v220_v60 = vunpack.c.h.b16 %v206_v41  ;;  %s969_s30 = sshra.s32 %s716_s29, 4  ;;  %s970_s30 = int_to_ptr.hbm [resolvable:$true] %s969_s30 }
  0x16   : > { %v223_v6 = vpack.c.b16 %v217_v2, %v217_v2  ;;  %v224_v7 = vpack.c.b16 %v218_v3, %v218_v3  ;;  %v221_v8 = vpack.c.b16 %v215_v4, %v215_v4  ;;  %v222_v9 = vpack.c.b16 %v216_v5, %v216_v5  ;;  %v200_v14 = vld [vmem:[%s196_s9] sm:$0xff]  ;;  %v201_v15 = vld [vmem:[%s196_s9 + $0x8] sm:$0xff]  ;;  %s971_s5 = scalar_lea.hbm %s970_s30, 16  ;;  %p976_p0 = scmp.lt.s32.totalorder %s970_s30, %s1236_s4 }
  0x17   : > { %v202_v16 = vpack.c.bf16 %v200_v14, %v200_v14  ;;  %v203_v17 = vpack.c.bf16 %v201_v15, %v201_v15  ;;  %vm338_vm2 = vcmp.ge.s32.totalorder %v335_v38, %v337_v39  ;;  %v225_v45 = vpack.c.b16 %v219_v43, %v219_v43  ;;  %v885_v39 = vld [vmem:[%s1234_s2 + $0x28] sm:$0xff]  ;;  %p972_p11 = scmp.ne.s32.totalorder %s970_s30, %s971_s5  ;;  %p977_p1 = scmp.lt.s32.totalorder %s975_s8, %s971_s5 }
  0x18   : > { %v239_v10 = vsel %vm231_vm0, %v223_v6, 0  ;;  %v242_v11 = vsel %vm231_vm0, %v224_v7, 0  ;;  %v233_v12 = vsel %vm231_vm0, %v221_v8, 0  ;;  %v236_v13 = vsel %vm231_vm0, %v222_v9, 0 }
  0x19   : > { %285 = vmatpush.bf16.msra.mxu2 %v239_v10  ;;  %299 = vmatpush.bf16.msra.mxu3 %v242_v11  ;;  %v209_v18 = vunpack.c.l.b16 %v202_v16  ;;  %v210_v19 = vunpack.c.l.b16 %v203_v17  ;;  %v245_v46 = vsel %vm231_vm0, %v225_v45, 0  ;;  %v226_v61 = vpack.c.b16 %v220_v60, %v220_v60  ;;  %v883_v45 = vld [vmem:[%s1234_s2 + $0x18] sm:$0xff]  ;;  %v890_v60 = vld [vmem:[%s1234_s2 + $0x50] sm:$0xff]  ;;  %p973_p12 = pnand %p972_p11, %p1084_p5  ;;  %p978_p2 = por %p977_p1, %p976_p0 }
  0x1a   : > { %257 = vmatpush.bf16.msra.mxu0 %v233_v12  ;;  %271 = vmatpush.bf16.msra.mxu1 %v236_v13 }
  0x1b   : > { %v1108_v20 = vpack.c.b16 %v210_v19, %v209_v18  ;;  %v248_v62 = vsel %vm231_vm0, %v226_v61, 0  ;;  %v889_v61 = vld [vmem:[%s1234_s2 + $0x48] sm:$0xff]  ;;  %p974_p13 = pneg %p973_p12 }
  0x1d   : > { %787 = vmatmul.msk.bf16.vlgmr.msra.gmra.mxu2 %vm227_vm1, %v1108_v20  ;;  %788 = vmatmul.msk.bf16.vlgmr.msra.gmra.mxu3 %vm227_vm1, %v1108_v20  ;;  %p979_p3 = pnand %p978_p2, %p974_p13 }
  0x1e   : > { %785 = vmatmul.msk.bf16.vlgmr.msra.gmra.mxu0 %vm227_vm1, %v1108_v20  ;;  %786 = vmatmul.msk.bf16.vlgmr.msra.gmra.mxu1 %vm227_vm1, %v1108_v20 }
  0x1f   : > { %313 = vmatpush.bf16.msrb.mxu0 %v245_v46  ;;  %327 = vmatpush.bf16.msrb.mxu1 %v248_v62  ;;  %v888_v62 = vld [vmem:[%s1234_s2 + $0x40] sm:$0xff] }
  0x2e   : > { %789 = vmatmul.msk.bf16.vlgmr.msrb.gmra.mxu0 %vm227_vm1, %v1108_v20  ;;  %790 = vmatmul.msk.bf16.vlgmr.msrb.gmra.mxu1 %vm227_vm1, %v1108_v20 }
  0x9b   : > { %v259_v25 = vpop.f32.mrf.mxu0  ;;  %v273_v33 = vpop.f32.mrf.mxu1 }
  0x9c   : > { %v339_v26 = vpack.c.bf16 %v259_v25, %v259_v25  ;;  %v454_v34 = vpack.c.bf16 %v273_v33, %v273_v33  ;;  %v895_v33 = vld [vmem:[%s1234_s2 + $0x78] sm:$0xff] }
  0xa0   : > { %v287_v21 = vpop.f32.mrf.mxu2  ;;  %v301_v22 = vpop.f32.mrf.mxu3 }
  0xa1   : > { %v341_v23 = vpack.c.bf16 %v287_v21, %v287_v21  ;;  %v456_v24 = vpack.c.bf16 %v301_v22, %v301_v22 }
  0xa3   : > { %350 = vmatpush.bf16.xpose.msrb.mxu2 %v341_v23  ;;  %v261_v31 = vpop.f32.mrf.mxu0  ;;  %v275_v35 = vpop.f32.mrf.mxu1 }
  0xa4   : > { %v340_v32 = vpack.c.bf16 %v261_v31, %v261_v31  ;;  %v455_v36 = vpack.c.bf16 %v275_v35, %v275_v35 }
  0xa8   : > { %v289_v27 = vpop.f32.mrf.mxu2  ;;  %v303_v28 = vpop.f32.mrf.mxu3 }
  0xa9   : > { %v342_v29 = vpack.c.bf16 %v289_v27, %v289_v27  ;;  %v457_v30 = vpack.c.bf16 %v303_v28, %v303_v28 }
  0xaa   : > { %351 = vmatmul.bf16.vlgmr.msrb.gmra.mxu2 %v339_v26 }
  0xab   : > { %465 = vmatpush.bf16.xpose.msra.mxu2 %v456_v24  ;;  %363 = vmatpush.bf16.xpose.msrb.mxu3 %v342_v29  ;;  %v315_v8 = vpop.f32.mrf.mxu0  ;;  %v329_v25 = vpop.f32.mrf.mxu1 }
  0xac   : > { %v397_v10 = vpack.c.bf16 %v315_v8, %v315_v8  ;;  %v510_v26 = vpack.c.bf16 %v329_v25, %v329_v25 }
  0xae   : > { %v403_v13 = vsel %vm231_vm0, %v397_v10, 0  ;;  %v516_v27 = vsel %vm231_vm0, %v510_v26, 0  ;;  %v938_v10 = vld [vmem:[%s1235_s3] ss:$0 sm:$0xff] }
  0xaf   : > { %412 = vmatpush.bf16.msra.mxu0 %v403_v13 }
  0xb2   : > { %364 = vmatmul.bf16.vlgmr.msrb.gmra.mxu3 %v340_v32  ;;  %v887_v32 = vld [vmem:[%s1234_s2 + $0x38] sm:$0xff] }
  0xb3   : > { %478 = vmatpush.bf16.xpose.msra.mxu3 %v457_v30  ;;  %v317_v22 = vpop.f32.mrf.mxu0  ;;  %v331_v28 = vpop.f32.mrf.mxu1  ;;  %525 = vmatpush.bf16.msrb.mxu0 %v516_v27 }
  0xb4   : > { %v398_v23 = vpack.c.bf16 %v317_v22, %v317_v22  ;;  %v511_v29 = vpack.c.bf16 %v331_v28, %v331_v28  ;;  %616 = vmatpush.bf16.msrb.mxu2 %v895_v33 }
  0xb6   : > { %v422_v24 = vsel %vm231_vm0, %v398_v23, 0  ;;  %v535_v30 = vsel %vm231_vm0, %v511_v29, 0 }
  0xb7   : > { %431 = vmatpush.bf16.msra.mxu1 %v422_v24 }
  0xba   : > { %466 = vmatmul.bf16.vlgmr.msra.gmra.mxu2 %v454_v34  ;;  %v886_v34 = vld [vmem:[%s1234_s2 + $0x30] sm:$0xff] }
  0xbb   : > { %544 = vmatpush.bf16.msrb.mxu1 %v535_v30  ;;  %678 = vmatpush.bf16.msrb.mxu3 %v887_v32 }
  0xbf   : > { %679 = vmatpush.bf16.msrb.mxu3 %v886_v34 }
  0xc2   : > { %479 = vmatmul.bf16.vlgmr.msra.gmra.mxu3 %v455_v36 }
  0xc3   : > { %680 = vmatpush.bf16.msrb.mxu3 %v885_v39 }
 0x12d   : > { %v352_v40 = vpop.f32.mrf.mxu2 }
 0x12e   : > { %v371_v42 = vsel %vm338_vm2, %v352_v40, -1e+30  ;;  %v884_v40 = vld [vmem:[%s1234_s2 + $0x20] sm:$0xff] }
 0x12f   : > { %v373_v44 = vsel %vm227_vm1, %v371_v42, -inf  ;;  %681 = vmatpush.bf16.msrb.mxu3 %v884_v40 }
 0x130   : > { %374 = vmax.xlane.f32.xlu0 %v373_v44 }
 0x133   : > { %682 = vmatpush.bf16.msrb.mxu3 %v883_v45 }
 0x135   : > { %v354_v47 = vpop.f32.mrf.mxu2  ;;  %v365_v48 = vpop.f32.mrf.mxu3 }
 0x136   : > { %v372_v49 = vsel %vm338_vm2, %v365_v48, -1e+30 }
 0x137   : > { %v376_v50 = vsel %vm227_vm1, %v372_v49, -inf }
 0x138   : > { %377 = vmax.xlane.f32.xlu0 %v376_v50 }
 0x13d   : > { %v367_v51 = vpop.f32.mrf.mxu3  ;;  %v467_v52 = vpop.f32.mrf.mxu2 }
 0x13e   : > { %v484_v53 = vsel %vm338_vm2, %v467_v52, -1e+30 }
 0x13f   : > { %v486_v54 = vsel %vm227_vm1, %v484_v53, -inf }
 0x140   : > { %487 = vmax.xlane.f32.xlu1 %v486_v54  ;;  %v882_v54 = vld [vmem:[%s1234_s2 + $0x10] sm:$0xff] }
 0x141   : > { %683 = vmatpush.bf16.msrb.mxu3 %v882_v54 }
 0x145   : > { %v480_v55 = vpop.f32.mrf.mxu3  ;;  %v469_v56 = vpop.f32.mrf.mxu2 }
 0x146   : > { %v485_v57 = vsel %vm338_vm2, %v480_v55, -1e+30  ;;  %v893_v55 = vld [vmem:[%s1234_s2 + $0x68] sm:$0xff] }
 0x147   : > { %v489_v58 = vsel %vm227_vm1, %v485_v57, -inf  ;;  %v881_v56 = vld [vmem:[%s1234_s2 + $0x8] sm:$0xff] }
 0x148   : > { %490 = vmax.xlane.f32.xlu1 %v489_v58  ;;  %684 = vmatpush.bf16.msrb.mxu3 %v881_v56  ;;  %v880_v58 = vld [vmem:[%s1234_s2] sm:$0xff] }
 0x14c   : > { %685 = vmatpush.bf16.msrb.mxu3 %v880_v58 }
 0x14d   : > { %v482_v59 = vpop.f32.mrf.mxu3 }
 0x14e   : > { %v891_v59 = vld [vmem:[%s1234_s2 + $0x58] sm:$0xff] }
 0x1a3   : > { %v375_v63 = vpop.xlane.xlu0 %374 }
 0x1a4   : > { %v379_v0 = vsub.f32 %v371_v42, %v375_v63 }
 0x1a6   : > { %v381_v1 = vmul.f32 1.442695, %v379_v0 }
 0x1a8   : > { %939 = vpow2.f32 %v381_v1 }
 0x1ab   : > { %v378_v2 = vpop.xlane.xlu0 %377 }
 0x1ac   : > { %v380_v3 = vsub.f32 %v372_v49, %v378_v2 }
 0x1ae   : > { %v940_v4 = vpop.eup %939  ;;  %v383_v5 = vmul.f32 1.442695, %v380_v3 }
 0x1af   : > { %v385_v6 = vsel %vm227_vm1, %v940_v4, 0.0 }
 0x1b0   : > { %941 = vpow2.f32 %v383_v5  ;;  %386 = vadd.xlane.f32.xlu2 %v385_v6 }
 0x1b3   : > { %v488_v7 = vpop.xlane.xlu1 %487 }
 0x1b4   : > { %v492_v9 = vsub.f32 %v484_v53, %v488_v7  ;;  %v894_v53 = vld [vmem:[%s1234_s2 + $0x70] sm:$0xff] }
 0x1b5   : > { %617 = vmatpush.bf16.msrb.mxu2 %v894_v53 }
 0x1b6   : > { %v942_v11 = vpop.eup %941  ;;  %v494_v12 = vmul.f32 1.442695, %v492_v9 }
 0x1b7   : > { %v388_v14 = vsel %vm227_vm1, %v942_v11, 0.0 }
 0x1b8   : > { %943 = vpow2.f32 %v494_v12  ;;  %389 = vadd.xlane.f32.xlu2 %v388_v14 }
 0x1b9   : > { %618 = vmatpush.bf16.msrb.mxu2 %v893_v55 }
 0x1bb   : > { %v491_v15 = vpop.xlane.xlu1 %490 }
 0x1bc   : > { %v493_v16 = vsub.f32 %v485_v57, %v491_v15  ;;  %v892_v57 = vld [vmem:[%s1234_s2 + $0x60] sm:$0xff] }
 0x1bd   : > { %619 = vmatpush.bf16.msrb.mxu2 %v892_v57 }
 0x1be   : > { %v944_v17 = vpop.eup %943  ;;  %v496_v18 = vmul.f32 1.442695, %v493_v16 }
 0x1bf   : > { %v498_v19 = vsel %vm227_vm1, %v944_v17, 0.0 }
 0x1c0   : > { %945 = vpow2.f32 %v496_v18  ;;  %499 = vadd.xlane.f32.xlu0 %v498_v19 }
 0x1c1   : > { %620 = vmatpush.bf16.msrb.mxu2 %v891_v59 }
 0x1c5   : > { %621 = vmatpush.bf16.msrb.mxu2 %v890_v60 }
 0x1c6   : > { %v946_v20 = vpop.eup %945 }
 0x1c7   : > { %v501_v21 = vsel %vm227_vm1, %v946_v20, 0.0 }
 0x1c8   : > { %502 = vadd.xlane.f32.xlu1 %v501_v21 }
 0x1c9   : > { %622 = vmatpush.bf16.msrb.mxu2 %v889_v61 }
 0x1cd   : > { %623 = vmatpush.bf16.msrb.mxu2 %v888_v62 }
 0x223   : > { %v387_v31 = vpop.xlane.xlu2 %386 }
 0x224   : > { %947 = vrcp.f32 %v387_v31 }
 0x22a   : > { %v948_v35 = vpop.eup %947 }
 0x22b   : > { %v393_v36 = vmul.f32 %v948_v35, %v940_v4  ;;  %v390_v37 = vpop.xlane.xlu2 %389 }
 0x22c   : > { %949 = vrcp.f32 %v390_v37 }
 0x22d   : > { %v395_v38 = vpack.c.bf16 %v393_v36, %v393_v36 }
 0x22f   : > { %791 = vmatmul.msk.bf16.vlgmr.msra.gmra.mxu0 %vm227_vm1, %v395_v38 }
 0x232   : > { %v950_v41 = vpop.eup %949 }
 0x233   : > { %v394_v42 = vmul.f32 %v950_v41, %v942_v11  ;;  %v500_v43 = vpop.xlane.xlu0 %499 }
 0x234   : > { %951 = vrcp.f32 %v500_v43 }
 0x235   : > { %v396_v44 = vpack.c.bf16 %v394_v42, %v394_v42 }
 0x237   : > { %792 = vmatmul.msk.bf16.vlgmr.msra.gmra.mxu1 %vm227_vm1, %v396_v44 }
 0x23a   : > { %v952_v46 = vpop.eup %951 }
 0x23b   : > { %v506_v47 = vmul.f32 %v952_v46, %v944_v17  ;;  %v503_v48 = vpop.xlane.xlu1 %502 }
 0x23c   : > { %953 = vrcp.f32 %v503_v48 }
 0x23d   : > { %v508_v49 = vpack.c.bf16 %v506_v47, %v506_v47 }
 0x23f   : > { %793 = vmatmul.msk.bf16.vlgmr.msrb.gmra.mxu0 %vm227_vm1, %v508_v49 }
 0x242   : > { %v954_v50 = vpop.eup %953 }
 0x243   : > { %v507_v51 = vmul.f32 %v954_v50, %v946_v20 }
 0x245   : > { %v509_v52 = vpack.c.bf16 %v507_v51, %v507_v51 }
 0x247   : > { %794 = vmatmul.msk.bf16.vlgmr.msrb.gmra.mxu1 %vm227_vm1, %v509_v52 }
 0x2ac   : > { %v414_v63 = vpop.f32.mrf.mxu0 }
 0x2b4   : > { %v416_v0 = vpop.f32.mrf.mxu0  ;;  %v433_v1 = vpop.f32.mrf.mxu1 }
 0x2b5   : > { %v437_v2 = vpack.c.bf16 %v433_v1, %v414_v63 }
 0x2b7   : > { %686 = vmatmul.bf16.vlgmr.msrb.gmra.mxu3 %v437_v2 }
 0x2bc   : > { %v435_v3 = vpop.f32.mrf.mxu1  ;;  %v527_v4 = vpop.f32.mrf.mxu0 }
 0x2c4   : > { %v529_v5 = vpop.f32.mrf.mxu0  ;;  %v546_v6 = vpop.f32.mrf.mxu1 }
 0x2c5   : > { %v550_v7 = vpack.c.bf16 %v546_v6, %v527_v4 }
 0x2c7   : > { %624 = vmatmul.bf16.vlgmr.msrb.gmra.mxu2 %v550_v7 }
 0x2cc   : > { %v548_v8 = vpop.f32.mrf.mxu1 }
 0x33a   : > { %v687_v9 = vpop.f32.mrf.mxu3 }
 0x342   : > { %v689_v14 = vpop.f32.mrf.mxu3 }
 0x34a   : > { %v625_v11 = vpop.f32.mrf.mxu2 }
 0x34b   : > { %v688_v12 = vadd.f32 %v687_v9, %v625_v11 }
 0x34d   : > { %v696_v13 = vadd.f32 %v938_v10, %v688_v12 }
 0x34f   : > { %698 = vst.msk [vmem:[%s191_s27] sm:$0xff] %vm227_vm1, %v696_v13 }
 0x352   : > { %v627_v15 = vpop.f32.mrf.mxu2 }
 0x353   : > { %v690_v16 = vadd.f32 %v689_v14, %v627_v15 }
 0x355   : > { %v697_v17 = vadd.f32 %v938_v10, %v690_v16 }
 0x357   : > { %699 = vst.msk [vmem:[%s191_s27 + $0x8] sm:$0xff] %vm227_vm1, %v697_v17 }
 0x358   : > { %982 = shalt.err (!%p979_p3)
}
 0x359   : > { %s1019_s10 = smov 128   ;;  %s1020_s12 = smov 8  }
 0x35a   : > { %897 = dma.vmem_to_hbm [thread:$0]  (%p1084_p5), %s714_s28, 256, %s716_s29, %s701_s19, %s1019_s10, %s1019_s10, %s1020_s12  }
 0x35b PF: > { %p903_p4 = scmp.ge.s32.totalorder %s1017_s18, 2  ;;  %s730_s13 = sand.u32 1, %s1005_s15  }
 0x35c   : > { %s731_s14 = scalar_lea.sflag [#allocation3], %s730_s13 }
 0x35d   : > { %p900_p7 = pnand %p903_p4, %p1088_p6 }
 0x35f   : > { %p901_p8 = pneg %p900_p7 }
 0x361   : > { %1000 = dma.done.wait (%p901_p8), %s731_s14, 256  }
 0x362   : > { %1002 = vsyncadd (%p901_p8), %s731_s14, 4294967040  ;;  %p14_p9 = scmp.ge.s32.totalorder %s1071_s21, 4   ;;  %s1239_s15 = smov %s1009_s16 }
 0x363   : > { %s1240_s16 = smov %s1013_s17  ;;  %s1241_s17 = smov %s1082_s24 }
 0x364   : > { %s1242_s18 = smov %s1071_s21  ;;  %16 = sbr.rel (!%p14_p9) target bundleno = 3 (0x3), region = 72 }
 0x369   :  { %737 = vsyncpa [#allocation3], 1 }
 0x36a   :  { %739 = vsyncpa [#allocation3 + $0x1], 1 }

</bundles_post_ra>
